<compile_context>
chip_gen: v6e
topology: v6e:2x2x1
jax: 0.10.0
libtpu: 0.0.40
codegen_flags: <defaults>
</compile_context>

<pallas_src>
import math

import jax
import jax.numpy as jnp
from jax.experimental import pallas as pl
from jax.experimental.pallas import tpu as pltpu

LOG2 = math.log(2.0)
PI = math.pi


# --------------------------------------------------------------------------
# Small helpers
# --------------------------------------------------------------------------
def _round_up(x, m):
    return ((x + m - 1) // m) * m


def _ssp(x):
    """ShiftedSoftplus in f32: softplus(x) - log(2), numerically stable."""
    x = x.astype(jnp.float32)
    return jnp.maximum(x, 0.0) + jnp.log1p(jnp.exp(-jnp.abs(x))) - LOG2


def _tpu_vmem_config():
    """(vmem_limit_bytes, stream_budget_bytes, row_cap) by TPU generation.

    v5e / v6e: 128 MiB physical VMEM -> 64 MiB scoped limit, large tiles.
    v7x (or unknown): 64 MiB per TensorCore -> keep scoped limit <= 32 MiB.
    """
    cap_bytes = None
    try:
        info = pltpu.get_tpu_info()
        cap_bytes = int(getattr(info, "vmem_capacity_bytes", 0)) or None
    except Exception:
        cap_bytes = None
    if cap_bytes is not None and cap_bytes >= 100 * 1024 * 1024:
        return 64 * 1024 * 1024, 40 * 1024 * 1024, 16384
    return 32 * 1024 * 1024, 20 * 1024 * 1024, 8192


def _padded_row_bytes(streams):
    """Sum of per-row bytes over row-streamed arrays, with lane padding to 128."""
    return sum(_round_up(int(w), 128) * jnp.dtype(d).itemsize for w, d in streams)


def _row_tile(rows, per_row_bytes, budget_bytes, cap):
    """Row tile: fits `budget_bytes` double-buffered, multiple of 16 (bf16 sublane
    packing), and <= ceil(rows/2) so the parallel grid has >= 2 steps (v7x has
    2 TensorCores).  Small row counts use a single full-extent block."""
    if rows <= 16:
        return rows
    t = budget_bytes // max(1, per_row_bytes * 2)          # double-buffered streams
    t = min(int(t), int(cap), _round_up((rows + 1) // 2, 16))
    t = max(16, (t // 16) * 16)
    return t


def _compiler_params(vmem_limit):
    return pltpu.CompilerParams(
        dimension_semantics=("parallel",),
        vmem_limit_bytes=int(vmem_limit),
    )


# --------------------------------------------------------------------------
# Kernel 1: fused filter-MLP + lin1 + message multiply (per-edge)
#   msg = (xs @ lin1_w) * ( ssp(ea @ W1 + b1) @ W2 + b2 )
# where xs = x[src] * C(edge_weight) is pre-scaled in the wrapper.
# --------------------------------------------------------------------------
def _message_kernel(ea_ref, xs_ref, w1_ref, b1_ref, w2_ref, b2_ref, l1_ref, msg_ref):
    ea = ea_ref[...].astype(jnp.bfloat16)                         # (TE, G)
    h = jnp.dot(ea, w1_ref[...], preferred_element_type=jnp.float32) + b1_ref[...]
    h = _ssp(h)                                                   # f32
    w = jnp.dot(h.astype(jnp.bfloat16), w2_ref[...],
                preferred_element_type=jnp.float32) + b2_ref[...]  # (TE, F) f32
    he = jnp.dot(xs_ref[...], l1_ref[...],
                 preferred_element_type=jnp.float32)               # (TE, F) f32
    msg_ref[...] = (he * w).astype(msg_ref.dtype)


def compute_messages(edge_attr, xs_scaled, w1, b1, w2, b2, lin1_w,
                     *, vmem_limit, stream_budget, row_cap):
    E, G = edge_attr.shape
    H = xs_scaled.shape[1]
    F = w1.shape[1]
    per_row = _padded_row_bytes([(G, edge_attr.dtype),
                                 (H, xs_scaled.dtype),
                                 (F, jnp.bfloat16)])
    te = _row_tile(E, per_row, stream_budget, row_cap)
    return pl.pallas_call(
        _message_kernel,
        out_shape=jax.ShapeDtypeStruct((E, F), jnp.bfloat16),
        grid_spec=pltpu.PrefetchScalarGridSpec(
            num_scalar_prefetch=0,
            grid=(pl.cdiv(E, te),),
            in_specs=[
                pl.BlockSpec((te, G), lambda i: (i, 0)),   # edge_attr (streamed)
                pl.BlockSpec((te, H), lambda i: (i, 0)),   # x[src]*C  (streamed)
                pl.BlockSpec((G, F), lambda i: (0, 0)),    # mlp W1 (resident)
                pl.BlockSpec((1, F), lambda i: (0, 0)),    # mlp b1
                pl.BlockSpec((F, F), lambda i: (0, 0)),    # mlp W2
                pl.BlockSpec((1, F), lambda i: (0, 0)),    # mlp b2
                pl.BlockSpec((H, F), lambda i: (0, 0)),    # lin1 W
            ],
            out_specs=pl.BlockSpec((te, F), lambda i: (i, 0)),
        ),
        compiler_params=_compiler_params(vmem_limit),
    )(edge_attr, xs_scaled, w1, b1.reshape(1, F), w2, b2.reshape(1, F), lin1_w)


# --------------------------------------------------------------------------
# Kernel 2: fused epilogue  out = ssp(agg @ W_lin2 + b_lin2) @ W_lin + b_lin
# --------------------------------------------------------------------------
def _post_kernel(a_ref, w2_ref, b2_ref, wl_ref, bl_ref, o_ref):
    a = a_ref[...].astype(jnp.bfloat16)                           # (TN, F)
    h = jnp.dot(a, w2_ref[...], preferred_element_type=jnp.float32) + b2_ref[...]
    h = _ssp(h)
    o = jnp.dot(h.astype(jnp.bfloat16), wl_ref[...],
                preferred_element_type=jnp.float32) + bl_ref[...]
    o_ref[...] = o.astype(o_ref.dtype)


def post_block(agg, w2, b2, wl, bl, *, out_dtype, vmem_limit, stream_budget, row_cap):
    N, F = agg.shape
    H = w2.shape[1]
    per_row = _padded_row_bytes([(F, agg.dtype), (H, out_dtype)])
    tn = _row_tile(N, per_row, stream_budget, row_cap)
    return pl.pallas_call(
        _post_kernel,
        out_shape=jax.ShapeDtypeStruct((N, H), out_dtype),
        grid_spec=pltpu.PrefetchScalarGridSpec(
            num_scalar_prefetch=0,
            grid=(pl.cdiv(N, tn),),
            in_specs=[
                pl.BlockSpec((tn, F), lambda i: (i, 0)),   # agg (streamed)
                pl.BlockSpec((F, H), lambda i: (0, 0)),    # lin2 W (resident)
                pl.BlockSpec((1, H), lambda i: (0, 0)),    # lin2 b
                pl.BlockSpec((H, H), lambda i: (0, 0)),    # lin  W
                pl.BlockSpec((1, H), lambda i: (0, 0)),    # lin  b
            ],
            out_specs=pl.BlockSpec((tn, H), lambda i: (i, 0)),
        ),
        compiler_params=_compiler_params(vmem_limit),
    )(agg, w2, b2.reshape(1, H), wl, bl.reshape(1, H))


# --------------------------------------------------------------------------
# Full InteractionBlock forward
# --------------------------------------------------------------------------
def interaction_block(x, edge_index, edge_weight, edge_attr, params, cutoff):
    N, _ = x.shape
    F = params["lin1_w"].shape[1]
    vmem_limit, stream_budget, row_cap = _tpu_vmem_config()
    bf16 = jnp.bfloat16

    src, dst = edge_index[0], edge_index[1]

    # Cosine cutoff folded into the gathered node features: msg uses
    # ((x[src]*C) @ lin1_w) == C * (x[src] @ lin1_w).  The gather, the scale and
    # the bf16 cast fuse into one XLA op, keeping the lane-sparse (te,1)
    # edge_weight stream out of VMEM entirely.
    ew = edge_weight.astype(jnp.float32)
    C = 0.5 * (jnp.cos(ew * (PI / float(cutoff))) + 1.0)
    C = C * (ew < float(cutoff)).astype(jnp.float32)
    xs = (x[src].astype(jnp.float32) * C[:, None]).astype(bf16)

    msg = compute_messages(
        edge_attr, xs,
        params["mlp_w1"].astype(bf16), params["mlp_b1"],
        params["mlp_w2"].astype(bf16), params["mlp_b2"],
        params["lin1_w"].astype(bf16),
        vmem_limit=vmem_limit, stream_budget=stream_budget, row_cap=row_cap)

    # TODO(synk): the data-dependent scatter-add (MessagePassing aggr='add') stays
    # in plain JAX; a dense BlockSpec cannot express it.  Accumulate in f32.
    agg = jnp.zeros((N, F), jnp.float32).at[dst].add(msg.astype(jnp.float32))

    return post_block(agg,
                      params["lin2_w"].astype(bf16), params["lin2_b"],
                      params["lin_w"].astype(bf16), params["lin_b"],
                      out_dtype=x.dtype,
                      vmem_limit=vmem_limit, stream_budget=stream_budget,
                      row_cap=row_cap)


# --------------------------------------------------------------------------
# Plain-JAX f32 reference + test harness
# --------------------------------------------------------------------------
def interaction_block_ref(x, edge_index, edge_weight, edge_attr, params, cutoff):
    w = jax.nn.softplus(edge_attr @ params["mlp_w1"] + params["mlp_b1"]) - LOG2
    w = w @ params["mlp_w2"] + params["mlp_b2"]
    c = 0.5 * (jnp.cos(edge_weight * PI / cutoff) + 1.0)
    c = c * (edge_weight < cutoff).astype(x.dtype)
    w = w * c[:, None]
    h = x @ params["lin1_w"]
    src, dst = edge_index[0], edge_index[1]
    agg = jnp.zeros_like(h).at[dst].add(h[src] * w)
    h = agg @ params["lin2_w"] + params["lin2_b"]
    h = jax.nn.softplus(h) - LOG2
    return h @ params["lin_w"] + params["lin_b"]


def init_params(key, hidden, num_gaussians, num_filters):
    ks = jax.random.split(key, 9)

    def xavier(k, shape):
        limit = math.sqrt(6.0 / (shape[0] + shape[1]))
        return jax.random.uniform(k, shape, jnp.float32, -limit, limit)

    return {
        "mlp_w1": xavier(ks[0], (num_gaussians, num_filters)),
        "mlp_b1": 0.1 * jax.random.normal(ks[1], (num_filters,), jnp.float32),
        "mlp_w2": xavier(ks[2], (num_filters, num_filters)),
        "mlp_b2": 0.1 * jax.random.normal(ks[3], (num_filters,), jnp.float32),
        "lin1_w": xavier(ks[4], (hidden, num_filters)),
        "lin2_w": xavier(ks[5], (num_filters, hidden)),
        "lin2_b": 0.1 * jax.random.normal(ks[6], (hidden,), jnp.float32),
        "lin_w": xavier(ks[7], (hidden, hidden)),
        "lin_b": 0.1 * jax.random.normal(ks[8], (hidden,), jnp.float32),
    }


if __name__ == "__main__":
    key = jax.random.PRNGKey(0)
    hidden, num_gaussians, num_filters, cutoff = 32, 50, 64, 10.0
    num_nodes, num_edges = 8, 24

    k1, k2, k3, k4, kp = jax.random.split(key, 5)
    x = jax.random.normal(k1, (num_nodes, hidden), jnp.float32)
    edge_index = jax.random.randint(k2, (2, num_edges), 0, num_nodes)
    edge_weight = jax.random.uniform(k3, (num_edges,), jnp.float32, 0.0, cutoff * 1.2)
    edge_attr = jax.random.normal(k4, (num_edges, num_gaussians), jnp.float32)
    params = init_params(kp, hidden, num_gaussians, num_filters)

    out = interaction_block(x, edge_index, edge_weight, edge_attr, params, cutoff)
    out = jax.block_until_ready(out)

    ref = interaction_block_ref(x, edge_index, edge_weight, edge_attr, params, cutoff)
    assert out.shape == (num_nodes, hidden) and out.dtype == x.dtype
    # Tolerance reflects bf16 MXU streaming (f32 accumulation) vs a pure-f32
    # XLA reference: check the relative L2 error of the whole output block.
    err = float(jnp.linalg.norm(out.astype(jnp.float32) - ref))
    denom = float(jnp.linalg.norm(ref)) + 1e-12
    assert err / denom < 5e-2, f"relative L2 err {err / denom}"

    print("KERNEL_OK")
</pallas_src>

<mosaic_0001>
module attributes {stable_mosaic.version = 11 : i64} {
  func.func @_message_kernel(%arg0: i32, %arg1: memref<16x50xf32, #tpu.memory_space<vmem>>, %arg2: memref<16x32xbf16, #tpu.memory_space<vmem>>, %arg3: memref<50x64xbf16, #tpu.memory_space<vmem>>, %arg4: memref<1x64xf32, #tpu.memory_space<vmem>>, %arg5: memref<64x64xbf16, #tpu.memory_space<vmem>>, %arg6: memref<1x64xf32, #tpu.memory_space<vmem>>, %arg7: memref<32x64xbf16, #tpu.memory_space<vmem>>, %arg8: memref<16x64xbf16, #tpu.memory_space<vmem>>) attributes {dimension_semantics = [#tpu.dimension_semantics<parallel>], iteration_bounds = array<i64: 2>, scalar_prefetch = 0 : i64, scratch_operands = 0 : i64, tpu.core_type = #tpu.core_type<tc>, window_params = [{transform_indices = @transform_0, window_bounds = array<i64: 16, 50>}, {transform_indices = @transform_1, window_bounds = array<i64: 16, 32>}, {pipeline_mode = #tpu.pipeline_mode<synchronous>, transform_indices = @transform_2, window_bounds = array<i64: 50, 64>}, {pipeline_mode = #tpu.pipeline_mode<synchronous>, transform_indices = @transform_3, window_bounds = array<i64: 1, 64>}, {pipeline_mode = #tpu.pipeline_mode<synchronous>, transform_indices = @transform_4, window_bounds = array<i64: 64, 64>}, {pipeline_mode = #tpu.pipeline_mode<synchronous>, transform_indices = @transform_5, window_bounds = array<i64: 1, 64>}, {pipeline_mode = #tpu.pipeline_mode<synchronous>, transform_indices = @transform_6, window_bounds = array<i64: 32, 64>}, {transform_indices = @transform_7, window_bounds = array<i64: 16, 64>}]} {
    %c0 = arith.constant 0 : index
    %c0_0 = arith.constant 0 : index
    %0 = vector.load %arg1[%c0, %c0_0] : memref<16x50xf32, #tpu.memory_space<vmem>>, vector<16x50xf32>
    %1 = arith.truncf %0 : vector<16x50xf32> to vector<16x50xbf16>
    %c0_1 = arith.constant 0 : index
    %c0_2 = arith.constant 0 : index
    %2 = vector.load %arg3[%c0_1, %c0_2] : memref<50x64xbf16, #tpu.memory_space<vmem>>, vector<50x64xbf16>
    %cst = arith.constant dense<0.000000e+00> : vector<16x64xf32>
    %3 = tpu.matmul %1, %2, %cst {dimension_numbers = #tpu.dot_dimension_numbers<[1], [0], [0], [1], [0, 0, 1, 1], [], []>} : vector<16x50xbf16>, vector<50x64xbf16>, vector<16x64xf32> -> vector<16x64xf32>
    %c0_3 = arith.constant 0 : index
    %c0_4 = arith.constant 0 : index
    %4 = vector.load %arg4[%c0_3, %c0_4] : memref<1x64xf32, #tpu.memory_space<vmem>>, vector<1x64xf32>
    %5 = vector.broadcast %4 : vector<1x64xf32> to vector<16x64xf32>
    %6 = arith.addf %3, %5 : vector<16x64xf32>
    %cst_5 = arith.constant 0.000000e+00 : f32
    %7 = vector.broadcast %cst_5 : f32 to vector<16x64xf32>
    %8 = arith.maximumf %6, %7 : vector<16x64xf32>
    %9 = math.absf %6 : vector<16x64xf32>
    %cst_6 = arith.constant 0.000000e+00 : f32
    %10 = vector.broadcast %cst_6 : f32 to vector<16x64xf32>
    %11 = arith.subf %10, %9 : vector<16x64xf32>
    %12 = math.exp %11 : vector<16x64xf32>
    %13 = math.log1p %12 : vector<16x64xf32>
    %14 = arith.addf %8, %13 : vector<16x64xf32>
    %cst_7 = arith.constant 0.693147182 : f32
    %15 = vector.broadcast %cst_7 : f32 to vector<16x64xf32>
    %16 = arith.subf %14, %15 : vector<16x64xf32>
    %17 = arith.truncf %16 : vector<16x64xf32> to vector<16x64xbf16>
    %c0_8 = arith.constant 0 : index
    %c0_9 = arith.constant 0 : index
    %18 = vector.load %arg5[%c0_8, %c0_9] : memref<64x64xbf16, #tpu.memory_space<vmem>>, vector<64x64xbf16>
    %cst_10 = arith.constant dense<0.000000e+00> : vector<16x64xf32>
    %19 = tpu.matmul %17, %18, %cst_10 {dimension_numbers = #tpu.dot_dimension_numbers<[1], [0], [0], [1], [0, 0, 1, 1], [], []>} : vector<16x64xbf16>, vector<64x64xbf16>, vector<16x64xf32> -> vector<16x64xf32>
    %c0_11 = arith.constant 0 : index
    %c0_12 = arith.constant 0 : index
    %20 = vector.load %arg6[%c0_11, %c0_12] : memref<1x64xf32, #tpu.memory_space<vmem>>, vector<1x64xf32>
    %21 = vector.broadcast %20 : vector<1x64xf32> to vector<16x64xf32>
    %22 = arith.addf %19, %21 : vector<16x64xf32>
    %c0_13 = arith.constant 0 : index
    %c0_14 = arith.constant 0 : index
    %23 = vector.load %arg2[%c0_13, %c0_14] : memref<16x32xbf16, #tpu.memory_space<vmem>>, vector<16x32xbf16>
    %c0_15 = arith.constant 0 : index
    %c0_16 = arith.constant 0 : index
    %24 = vector.load %arg7[%c0_15, %c0_16] : memref<32x64xbf16, #tpu.memory_space<vmem>>, vector<32x64xbf16>
    %cst_17 = arith.constant dense<0.000000e+00> : vector<16x64xf32>
    %25 = tpu.matmul %23, %24, %cst_17 {dimension_numbers = #tpu.dot_dimension_numbers<[1], [0], [0], [1], [0, 0, 1, 1], [], []>} : vector<16x32xbf16>, vector<32x64xbf16>, vector<16x64xf32> -> vector<16x64xf32>
    %26 = arith.mulf %25, %22 : vector<16x64xf32>
    %27 = arith.truncf %26 : vector<16x64xf32> to vector<16x64xbf16>
    %c0_18 = arith.constant 0 : index
    %c0_19 = arith.constant 0 : index
    %28 = vector.load %arg8[%c0_18, %c0_19] : memref<16x64xbf16, #tpu.memory_space<vmem>>, vector<16x64xbf16>
    tpu.vector_store %arg8[%c0_18, %c0_19], %27 {strides = array<i32>} : memref<16x64xbf16, #tpu.memory_space<vmem>>, vector<16x64xbf16>,
    return
  }
  func.func @transform_0(%arg0: i32) -> (i32, i32) {
    %c0_i32 = arith.constant 0 : i32
    %c0_i32_0 = arith.constant 0 : i32
    return %arg0, %c0_i32 : i32, i32
  }
  func.func @transform_1(%arg0: i32) -> (i32, i32) {
    %c0_i32 = arith.constant 0 : i32
    %c0_i32_0 = arith.constant 0 : i32
    return %arg0, %c0_i32 : i32, i32
  }
  func.func @transform_2(%arg0: i32) -> (i32, i32) {
    %c0_i32 = arith.constant 0 : i32
    %c0_i32_0 = arith.constant 0 : i32
    %c0_i32_1 = arith.constant 0 : i32
    return %c0_i32, %c0_i32_0 : i32, i32
  }
  func.func @transform_3(%arg0: i32) -> (i32, i32) {
    %c0_i32 = arith.constant 0 : i32
    %c0_i32_0 = arith.constant 0 : i32
    %c0_i32_1 = arith.constant 0 : i32
    return %c0_i32, %c0_i32_0 : i32, i32
  }
  func.func @transform_4(%arg0: i32) -> (i32, i32) {
    %c0_i32 = arith.constant 0 : i32
    %c0_i32_0 = arith.constant 0 : i32
    %c0_i32_1 = arith.constant 0 : i32
    return %c0_i32, %c0_i32_0 : i32, i32
  }
  func.func @transform_5(%arg0: i32) -> (i32, i32) {
    %c0_i32 = arith.constant 0 : i32
    %c0_i32_0 = arith.constant 0 : i32
    %c0_i32_1 = arith.constant 0 : i32
    return %c0_i32, %c0_i32_0 : i32, i32
  }
  func.func @transform_6(%arg0: i32) -> (i32, i32) {
    %c0_i32 = arith.constant 0 : i32
    %c0_i32_0 = arith.constant 0 : i32
    %c0_i32_1 = arith.constant 0 : i32
    return %c0_i32, %c0_i32_0 : i32, i32
  }
  func.func @transform_7(%arg0: i32) -> (i32, i32) {
    %c0_i32 = arith.constant 0 : i32
    %c0_i32_0 = arith.constant 0 : i32
    return %arg0, %c0_i32 : i32, i32
  }
}

</mosaic_0001>

<bundles_post_ra>
// kernel: tpu_custom_call.1
= control target key start
LH: loop header
LB: loop body
LE: loop exit
PB: predicated region body
PF: predicated region fallthrough
CT: control target
= control target key end

     0   :  { %s1601_s0 = inlined_call_operand.hbm [shape: f32[24,50], index: 0, kind: input, shape index: {}]   ;;  %s1602_s1 = inlined_call_operand.hbm [shape: bf16[24,32], index: 1, kind: input, shape index: {}]   ;;  %s1603_s2 = inlined_call_operand.hbm [shape: bf16[50,64], index: 2, kind: input, shape index: {}]   ;;  %s1604_s3 = inlined_call_operand.vmem [shape: f32[1,64], index: 3, kind: input, shape index: {}]   ;;  %s1605_s4 = inlined_call_operand.hbm [shape: bf16[64,64], index: 4, kind: input, shape index: {}]   ;;  %s1606_s5 = inlined_call_operand.vmem [shape: f32[1,64], index: 5, kind: input, shape index: {}]   ;;  %s1607_s6 = inlined_call_operand.hbm [shape: bf16[32,64], index: 6, kind: input, shape index: {}]   ;;  %s1608_s7 = inlined_call_operand.hbm [shape: bf16[24,64], index: 7, kind: output, shape index: {}]  }
   0x1   :  { %1612 = sst [smem:[#allocation17_spill]] %s1603_s2 }
   0x2   :  { %1613 = sst [smem:[#allocation18_spill]] %s1605_s4 }
   0x3   :  { %1614 = sst [smem:[#allocation19_spill]] %s1607_s6 }
   0x4   :  { %12 = vsyncpa [#allocation3], 0 }
   0x5   :  { %14 = vsyncpa [#allocation3 + $0x1], 0 }
   0x6   :  { %15 = vsyncpa [#allocation6], 0 }
   0x7   :  { %17 = vsyncpa [#allocation6 + $0x1], 0 }
   0x8   :  { %18 = vsyncpa [#allocation9], 0 }
   0x9   :  { %19 = vsyncpa [#allocation4], 0 }
   0xa   :  { %21 = vsyncpa [#allocation4 + $0x1], 0  ;;  %s1307_s24 = smov 0   ;;  %s1309_s25 = smov 0  }
   0xb   :  { %s1311_s26 = smov 0   ;;  %s1313_s27 = smov 0  }
   0xc LB: > { %s1328_s28 = sadd.s32 4294967295, %s1249_s27   ;;  %s837_s29 = sadd.s32 4294967294, %s1249_s27   ;;  %s1249_s27 = sphi %s1313_s27, %s1635_s27   ;;  %s1245_s26 = sphi %s1311_s26, %s1634_s26   ;;  %s1241_s25 = sphi %s1309_s25, %s1633_s25   ;;  %s1237_s24 = sphi %s1307_s24, %s1632_s24  }
   0xd   : > { %s1332_s30 = sadd.s32 1, %s1249_s27   ;;  %s34_s8 = sadd.s32 1, %s1245_s26 }
   0xe   : > { %s31_s9 = ssub.s32 %s1249_s27, %s1332_s30  ;;  %p41_p0 = scmp.ne.s32.totalorder %s1245_s26, %s1241_s25 }
   0xf   : > { %p32_p1 = scmp.eq.s32.totalorder %s31_s9, 0  ;;  %p42_p2 = scmp.eq.s32.totalorder %s1249_s27, 0 }
  0x10   : > { %p47_p3 = scmp.ne.s32.totalorder %s1241_s25, %s1237_s24  ;;  %p1609_p4 = scmp.eq.s32.totalorder %s1328_s28, 0 }
  0x11   : > { %s1344_s10 = scalar_select %p32_p1, %s1245_s26, %s34_s8  }
  0x12   : > { %p1346_p5 = por %p42_p2, %p41_p0  ;;  %p1352_p6 = por %p1609_p4, %p47_p3 }
  0x13   : > { %p202_p7 = scmp.eq.s32.totalorder %s1328_s28, 1  ;;  %p208_p8 = scmp.eq.s32.totalorder %s837_s29, 1 }
  0x14   : > { %s1616_s12 = scalar_select %p1352_p6, 1, 0 }
  0x15   : > { %p838_p9 = scmp.ge.s32.totalorder %s1249_s27, 1  ;;  %p215_p10 = scmp.lt.s32.totalorder %s1249_s27, 3 }
  0x16   : > { %p1359_p11 = por %p202_p7, %p41_p0  ;;  %p1363_p12 = por %p208_p8, %p47_p3 }
  0x17   : > { %p1367_p13 = pnand %p838_p9, %p215_p10  ;;  %s1251_s16 = smov [#allocation8]  }
  0x18   : > { %s1617_s13 = scalar_select %p1359_p11, 1, 0 }
  0x19   : > { %s1618_s14 = scalar_select %p1363_p12, 1, 0 }
  0x1a   : > { %p958_p1 = pneg %p1367_p13  ;;  %s243_s17 = sshll.u32 %s1251_s16, 4  ;;  %s244_s17 = int_to_ptr.vmem [resolvable:$true] %s243_s17 }
  0x1b   : > { %s1252_s19 = smov [#allocation7]   ;;  %s1054_s21 = scalar_lea.vmem %s244_s17, 512 }
  0x1c   : > { %p1375_p2 = pnand %p958_p1, %p1609_p4  ;;  %s227_s20 = sshll.u32 %s1252_s19, 4  ;;  %s228_s20 = int_to_ptr.vmem [resolvable:$true] %s227_s20 }
  0x1d   : > { %p1055_p3 = scmp.ne.s32.totalorder %s244_s17, %s1054_s21  ;;  %p1062_p9 = scmp.lt.s32.totalorder %s244_s17, %s244_s17 }
  0x1e   : > { %p1045_p0 = pneg %p1375_p2  ;;  %p1063_p10 = scmp.lt.s32.totalorder %s1054_s21, %s1054_s21 }
  0x20   : > { %p1057_p7 = pnand %p1055_p3, %p1045_p0  ;;  %p1064_p1 = por %p1063_p10, %p1062_p9 }
  0x22   : > { %p1058_p8 = pneg %p1057_p7 }
  0x24   : > { %p1065_p4 = pnand %p1064_p1, %p1058_p8 }
  0x26   : > { %1068 = shalt.err (!%p1065_p4)
}
  0x27   : > { %s1253_s22 = smov 64   ;;  %s1254_s23 = smov 4  }
  0x28   : > { %s1621_s4 = sld [smem:[#allocation18_spill]]  ;;  %s1080_s9 = scalar_lea.vmem %s228_s20, 448 }
  0x29   : > { %p1081_p12 = scmp.ne.s32.totalorder %s228_s20, %s1080_s9  ;;  %p1088_p11 = scmp.lt.s32.totalorder %s228_s20, %s228_s20 }
  0x2a   : > { %p1089_p6 = scmp.lt.s32.totalorder %s1080_s9, %s1080_s9 }
  0x2b   : > { %p1083_p3 = pnand %p1081_p12, %p1045_p0 }
  0x2c   : > { %p1090_p9 = por %p1089_p6, %p1088_p11 }
  0x2d   : > { %p1084_p7 = pneg %p1083_p3 }
  0x2e   : > { %964 = dma.hbm_to_vmem [thread:$0]  (!%p1375_p2), %s1621_s4, 512, %s244_s17, [#allocation9], %s1253_s22, %s1253_s22, %s1254_s23  }
  0x2f   : > { %p1091_p8 = pnand %p1090_p9, %p1084_p7 }
  0x31   : > { %1094 = shalt.err (!%p1091_p8)
}
  0x32   : > { %s1622_s2 = sld [smem:[#allocation17_spill]]  ;;  %s1255_s21 = smov [#allocation10]  }
  0x33   : > { %s259_s17 = sshll.u32 %s1255_s21, 4  ;;  %s260_s17 = int_to_ptr.vmem [resolvable:$true] %s259_s17 }
  0x34   : > { %s1106_s29 = scalar_lea.vmem %s260_s17, 256  ;;  %p1114_p1 = scmp.lt.s32.totalorder %s260_s17, %s260_s17 }
  0x35   : > { %p1107_p4 = scmp.ne.s32.totalorder %s260_s17, %s1106_s29  ;;  %p1115_p6 = scmp.lt.s32.totalorder %s1106_s29, %s1106_s29 }
  0x37   : > { %p1109_p12 = pnand %p1107_p4, %p1045_p0  ;;  %p1116_p11 = por %p1115_p6, %p1114_p1 }
  0x38   : > { %961 = dma.hbm_to_vmem [thread:$0]  (!%p1375_p2), %s1622_s2, 448, %s228_s20, [#allocation6], %s1253_s22, %s1253_s22, %s1254_s23  }
  0x39   : > { %p1110_p10 = pneg %p1109_p12 }
  0x3b   : > { %p1117_p3 = pnand %p1116_p11, %p1110_p10 }
  0x3d   : > { %1120 = shalt.err (!%p1117_p3)
}
  0x3e   : > { %s1623_s6 = sld [smem:[#allocation19_spill]]  ;;  %p1611_p7 = scmp.ge.s32.totalorder %s1249_s27, 2 }
  0x40   : > { %269 = sbr.rel (%p1611_p7) target bundleno = 133 (0x85), region = 36 }
  0x44   : > { %967 = dma.hbm_to_vmem [thread:$0]  (!%p1375_p2), %s1623_s6, 256, %s260_s17, [#allocation9], %s1253_s22, %s1253_s22, %s1254_s23  }
  0x45   : > { %272 = sbr.rel (!%p1346_p5) target bundleno = 101 (0x65), region = 40  ;;  %s273_s20 = sand.u32 (%p1346_p5), 1, %s1245_s26  }
  0x46   : > { %s844_s16 = sshll.u32 (%p1346_p5), %s1249_s27, 1  ;;  %s843_s19 = sshll.u32 (%p1346_p5), %s273_s20, 4 }
  0x47   : > { %s279_s21 = ssub.s32 (%p1346_p5), 3, %s844_s16  ;;  %s1415_s23 = scalar_lea.sflag (%p1346_p5), [#allocation3], %s273_s20 }
  0x48   : > { %p280_p0 = scmp.lt.s32.totalorder (%p1346_p5), %s279_s21, 2  ;;  %s277_s17 = scalar_lea.vmem (%p1346_p5), [#allocation2], %s843_s19 }
  0x4a   : > { %s1637_s21 = smov (!%p280_p0, %s279_s21), 2 }
  0x4b   : > { %s1412_s18 = sshll.u32 %s1637_s21, 7 }
  0x4c   : > { %s284_s22 = ssub.s32 256, %s1412_s18 }
  0x4d   : > { %285 = vsyncadd %s1415_s23, %s284_s22  ;;  %p846_p2 = scmp.ne.s32.totalorder %s1412_s18, 0  ;;  %s893_s29 = sshll.u32 %s1249_s27, 8 }
  0x4e   : > { %s1423_s16 = scalar_lea.hbm %s1601_s0, %s893_s29  ;;  %s290_s21 = sshll.u32 %s277_s17, 4  ;;  %s1425_s21 = int_to_ptr.vmem [resolvable:$true] %s290_s21 }
  0x4f   : > { %s1121_s20 = scalar_lea.hbm %s1423_s16, %s1412_s18  ;;  %s1125_s2 = scalar_lea.hbm %s1601_s0, 384 }
  0x50   : > { %p1122_p9 = scmp.ne.s32.totalorder %s1423_s16, %s1121_s20  ;;  %p1126_p12 = scmp.lt.s32.totalorder %s1423_s16, %s1601_s0 }
  0x51   : > { %p1127_p10 = scmp.lt.s32.totalorder %s1125_s2, %s1121_s20 }
  0x52   : > { %p1123_p8 = pnand %p1122_p9, %p846_p2 }
  0x53   : > { %p1128_p1 = por %p1127_p10, %p1126_p12 }
  0x54   : > { %p1124_p4 = pneg %p1123_p8 }
  0x56   : > { %p1129_p6 = pnand %p1128_p1, %p1124_p4 }
  0x58   : > { %1132 = shalt.err (!%p1129_p6)
}
  0x59   : > { %s1133_s17 = scalar_lea.vmem %s1425_s21, %s1412_s18  ;;  %s1256_s29 = smov [#allocation2]  }
  0x5a   : > { %p1134_p11 = scmp.ne.s32.totalorder %s1425_s21, %s1133_s17  ;;  %s1137_s8 = sshll.u32 %s1256_s29, 4  ;;  %s1138_s8 = int_to_ptr.vmem [resolvable:$false] %s1137_s8 }
  0x5b   : > { %s1139_s9 = scalar_lea.vmem %s1138_s8, 512  ;;  %p1140_p9 = scmp.lt.s32.totalorder %s1425_s21, %s1138_s8 }
  0x5c   : > { %p1135_p3 = pnand %p1134_p11, %p846_p2  ;;  %p1141_p8 = scmp.lt.s32.totalorder %s1139_s9, %s1133_s17 }
  0x5e   : > { %p1136_p0 = pneg %p1135_p3  ;;  %p1142_p7 = por %p1141_p8, %p1140_p9 }
  0x60   : > { %p1143_p12 = pnand %p1142_p7, %p1136_p0 }
  0x62   : > { %1146 = shalt.err (!%p1143_p12)
}
  0x63   : > { %s1257_s2 = smov 128   ;;  %s1258_s4 = smov 8  }
  0x64   : > { %296 = dma.hbm_to_vmem [thread:$0]  (%p846_p2), %s1423_s16, %s1412_s18, %s1425_s21, %s1415_s23, %s1257_s2, %s1257_s2, %s1258_s4  }
  0x65 PF: > { %299 = sbr.rel (!%p1346_p5) target bundleno = 133 (0x85), region = 44  ;;  %s300_s6 = sand.u32 (%p1346_p5), 1, %s1249_s27  }
  0x66   : > { %s302_s20 = sand.u32 (%p1346_p5), 1, %s1245_s26   ;;  %s851_s22 = sshll.u32 (%p1346_p5), %s1249_s27, 1 }
  0x67   : > { %s850_s19 = sshll.u32 (%p1346_p5), %s302_s20, 3  ;;  %s306_s17 = ssub.s32 (%p1346_p5), 3, %s851_s22 }
  0x68   : > { %p307_p7 = scmp.lt.s32.totalorder (%p1346_p5), %s306_s17, 2  ;;  %s1459_s9 = scalar_lea.sflag (%p1346_p5), [#allocation6], %s300_s6 }
  0x69   : > { %s304_s18 = scalar_lea.vmem (%p1346_p5), [#allocation5], %s850_s19 }
  0x6a   : > { %s1639_s17 = smov (!%p307_p7, %s306_s17), 2 }
  0x6b   : > { %s1456_s29 = sshll.u32 %s1639_s17, 6 }
  0x6c   : > { %s311_s8 = ssub.s32 128, %s1456_s29 }
  0x6d   : > { %312 = vsyncadd %s1459_s9, %s311_s8  ;;  %p853_p5 = scmp.ne.s32.totalorder %s1456_s29, 0  ;;  %s894_s11 = sshll.u32 %s1249_s27, 7 }
  0x6e   : > { %s1467_s21 = scalar_lea.hbm %s1602_s1, %s894_s11  ;;  %s317_s2 = sshll.u32 %s304_s18, 4  ;;  %s1469_s2 = int_to_ptr.vmem [resolvable:$true] %s317_s2 }
  0x6f   : > { %s1147_s4 = scalar_lea.hbm %s1467_s21, %s1456_s29  ;;  %s1151_s19 = scalar_lea.hbm %s1602_s1, 192 }
  0x70   : > { %p1148_p2 = scmp.ne.s32.totalorder %s1467_s21, %s1147_s4  ;;  %p1152_p1 = scmp.lt.s32.totalorder %s1467_s21, %s1602_s1 }
  0x71   : > { %p1153_p6 = scmp.lt.s32.totalorder %s1151_s19, %s1147_s4 }
  0x72   : > { %p1149_p4 = pnand %p1148_p2, %p853_p5 }
  0x73   : > { %p1154_p11 = por %p1153_p6, %p1152_p1 }
  0x74   : > { %p1150_p10 = pneg %p1149_p4 }
  0x76   : > { %p1155_p3 = pnand %p1154_p11, %p1150_p10 }
  0x78   : > { %1158 = shalt.err (!%p1155_p3)
}
  0x79   : > { %s1159_s8 = scalar_lea.vmem %s1469_s2, %s1456_s29  ;;  %s1259_s18 = smov [#allocation5]  }
  0x7a   : > { %p1160_p0 = scmp.ne.s32.totalorder %s1469_s2, %s1159_s8  ;;  %s1163_s11 = sshll.u32 %s1259_s18, 4  ;;  %s1164_s11 = int_to_ptr.vmem [resolvable:$false] %s1163_s11 }
  0x7b   : > { %s1165_s23 = scalar_lea.vmem %s1164_s11, 256  ;;  %p1166_p12 = scmp.lt.s32.totalorder %s1469_s2, %s1164_s11 }
  0x7c   : > { %p1161_p9 = pnand %p1160_p0, %p853_p5  ;;  %p1167_p7 = scmp.lt.s32.totalorder %s1165_s23, %s1159_s8 }
  0x7e   : > { %p1162_p8 = pneg %p1161_p9  ;;  %p1168_p2 = por %p1167_p7, %p1166_p12 }
  0x80   : > { %p1169_p4 = pnand %p1168_p2, %p1162_p8 }
  0x82   : > { %1172 = shalt.err (!%p1169_p4)
}
  0x83   : > { %s1260_s16 = smov 64   ;;  %s1261_s4 = smov 4  }
  0x84   : > { %323 = dma.hbm_to_vmem [thread:$0]  (%p853_p5), %s1467_s21, %s1456_s29, %s1469_s2, %s1459_s9, %s1260_s16, %s1260_s16, %s1261_s4  }
  0x85 PF: > { %329 = sbr.rel (%p1367_p13) target bundleno = 642 (0x282), region = 48  ;;  %s1498_s6 = sand.u32 (!%p1367_p13), 1, %s1241_s25  }
  0x86   : > { %s858_s20 = sshll.u32 (!%p1367_p13), %s1498_s6, 4  ;;  %s332_s19 = scalar_lea.sflag (!%p1367_p13), [#allocation3], %s1498_s6 }
  0x87   : > { %s1502_s22 = scalar_lea.vmem (!%p1367_p13), [#allocation2], %s858_s20  ;;  %p1624_p10 = scmp.ne.s32.totalorder (!%p1367_p13), %s1616_s12, 0 }
  0x8a   : > { %1216 = dma.done.wait (%p1624_p10), %s332_s19, 256  }
  0x8b   : > { %1218 = vsyncadd (%p1624_p10), %s332_s19, 4294967040  ;;  %s340_s15 = sand.u32 1, %s1328_s28   ;;  %s859_s29 = sshll.u32 %s1498_s6, 3 }
  0x8c   : > { %s341_s9 = scalar_lea.sflag [#allocation6], %s340_s15  ;;  %s1512_s21 = scalar_lea.vmem [#allocation5], %s859_s29 }
  0x8d   : > { %1220 = dma.done.wait (%p1624_p10), %s341_s9, 128  }
  0x8e   : > { %1222 = vsyncadd (%p1624_p10), %s341_s9, 4294967168  ;;  %p1625_p13 = scmp.eq.s32.totalorder %s1328_s28, 0 }
  0x90   : > { %1224 = dma.done.wait (%p1625_p13), [#allocation6], 448   ;;  %p1626_p5 = pmov %p1625_p13 }
  0x92   : > { %1226 = vsyncadd (%p1626_p5), [#allocation6], 4294966848  ;;  %p1627_p1 = pmov %p1626_p5 }
  0x94   : > { %1228 = dma.done.wait (%p1627_p1), [#allocation9], 768   ;;  %p1628_p6 = pmov %p1627_p1 }
  0x95   : > { %v1262_v0 = vmov 0.0   ;;  %vm1263_vm0 = vmmov 0   ;;  %vm450_vm1 = vcmask 1040384   ;;  %v1024_v1 = vld [vmem:[#allocation7 + $0x18] ss:$0 sps:$4 sm:$0x11]  }
  0x96   : > { %1230 = vsyncadd (%p1628_p6), [#allocation9], 4294966528  ;;  %911 = vmatprep.subr.bf16.mxu0 %v1262_v0  ;;  %919 = vmatprep.mubr.msk.bf16.mxu0 %vm1263_vm0, %v1262_v0  ;;  %v452_v2 = vsel %vm450_vm1, %v1024_v1, 0  ;;  %v1025_v3 = vld [vmem:[#allocation7 + $0x10] sm:$0xff]   ;;  %v1026_v4 = vld [vmem:[#allocation7 + $0x8] sm:$0xff]   ;;  %vm446_vm2 = vcmask 408576  }
  0x97   : > { %923 = vmatprep.subr.bf16.mxu1 %v1262_v0  ;;  %931 = vmatprep.mubr.msk.bf16.mxu1 %vm1263_vm0, %v1262_v0  ;;  %v1027_v5 = vld [vmem:[#allocation7] sm:$0xff]   ;;  %v409_v7 = vld [vmem:[%s1502_s22 + $0x8] sm:$0xff]  ;;  %v1033_v14 = vld [vmem:[%s1512_s21] sm:$0xff]   ;;  %vm635_vm3 = vcmask 261120   ;;  %vm567_vm6 = vcmask 523264   ;;  %vm690_vm7 = vcmask 519168  }
  0x98   : > { %912 = vmatpush3.bf16.msra.mxu0 %v452_v2  ;;  %v408_v6 = vld [vmem:[%s1502_s22] sm:$0xff]  ;;  %s391_s18 = scalar_lea.vmem [#allocation11], %s859_s29  ;;  %s694_s11 = scalar_lea.sflag [#allocation4], %s1498_s6 }
  0x99   : > { %913 = vmatprep.subr.bf16.mxu0 %v1262_v0  ;;  %v410_v8 = vpack.c.bf16 %v409_v7, %v408_v6  ;;  %v1028_v9 = vld [vmem:[#allocation8 + $0x18] sm:$0xff]   ;;  %v1029_v10 = vld [vmem:[#allocation8 + $0x10] sm:$0xff]   ;;  %v1030_v11 = vld [vmem:[#allocation10 + $0x8] sm:$0xff]   ;;  %p1629_p11 = scmp.ne.s32.totalorder %s1617_s13, 0 }
  0x9a   : > { %924 = vmatpush3.bf16.msra.mxu1 %v1028_v9  ;;  %v1031_v12 = vld [vmem:[#allocation8 + $0x8] sm:$0xff]   ;;  %v1032_v13 = vld [vmem:[#allocation10] sm:$0xff]   ;;  %v864_v16 = vld [vmem:[%s1604_s3] ss:$0 sm:$0xff]  ;;  %s885_s23 = sshll.u32 (%p1629_p11), %s1328_s28, 1 }
  0x9b   : > { %925 = vmatprep.subr.bf16.mxu1 %v1262_v0  ;;  %v1034_v15 = vld [vmem:[#allocation8] sm:$0xff]   ;;  %v872_v58 = vld [vmem:[%s1606_s5] ss:$0 sm:$0xff]  ;;  %s702_s16 = ssub.s32 (%p1629_p11), 3, %s885_s23 }
  0x9c   : > { %914 = vmatpush3.bf16.msra.mxu0 %v1025_v3  ;;  %p703_p3 = scmp.lt.s32.totalorder (%p1629_p11), %s702_s16, 2 }
  0x9d   : > { %915 = vmatprep.subr.bf16.mxu0 %v1262_v0 }
  0x9e   : > { %926 = vmatpush3.bf16.msra.mxu1 %v1029_v10 }
  0x9f   : > { %927 = vmatprep.subr.bf16.mxu1 %v1262_v0 }
  0xa0   : > { %916 = vmatpush3.bf16.msra.mxu0 %v1026_v4 }
  0xa1   : > { %917 = vmatprep.subr.bf16.mxu0 %v1262_v0 }
  0xa2   : > { %928 = vmatpush3.bf16.msra.mxu1 %v1031_v12 }
  0xa3   : > { %929 = vmatprep.subr.bf16.mxu1 %v1262_v0 }
  0xa4   : > { %918 = vmatpush3.bf16.msra.mxu0 %v1027_v5 }
  0xa5   : > { %935 = vmatprep.subr.bf16.mxu0 %v1262_v0 }
  0xa6   : > { %930 = vmatpush3.bf16.msra.mxu1 %v1034_v15 }
  0xa7   : > { %920 = vmatmul.mubr.msk.bf16.vlgmr.msra.gmra.mxu0 %vm446_vm2, %v410_v8 }
  0xa8   : > { %939 = vmatprep.mubr.msk.bf16.mxu0 %vm1263_vm0, %v1262_v0  ;;  %936 = vmatpush3.bf16.msra.mxu0 %v1030_v11 }
  0xa9   : > { %937 = vmatprep.subr.bf16.mxu0 %v1262_v0 }
  0xac   : > { %938 = vmatpush3.bf16.msra.mxu0 %v1032_v13 }
  0xaf   : > { %940 = vmatmul.mubr.msk.bf16.vlgmr.msra.gmra.mxu0 %vm635_vm3, %v1033_v14 }
 0x167   : > { %v488_v17 = vpop.f32.mrf.mxu0 }
 0x168   : > { %v489_v18 = vadd.f32 %v864_v16, %v488_v17 }
 0x169   : > { %v921_v19 = vpop.f32.mrf.mxu0 }
 0x16a   : > { %v497_v20 = vand.u32 2147483647, %v489_v18  ;;  %v495_v44 = vmax.f32 %v489_v18, 0.0 }
 0x16b   : > { %v491_v21 = vpop.f32.mrf.mxu0 }
 0x16c   : > { %v499_v22 = vsub.f32 0.0, %v497_v20  ;;  %v492_v23 = vadd.f32 %v864_v16, %v491_v21 }
 0x16d   : > { %v922_v24 = vpop.f32.mrf.mxu0 }
 0x16e   : > { %v501_v25 = vmul.f32 1.442695, %v499_v22  ;;  %v498_v26 = vand.u32 2147483647, %v492_v23  ;;  %v496_v48 = vmax.f32 %v492_v23, 0.0 }
 0x16f   : > { %v673_v54 = vpop.f32.mrf.mxu0 }
 0x170   : > { %1035 = vpow2.f32 %v501_v25  ;;  %v500_v27 = vsub.f32 0.0, %v498_v26 }
 0x171   : > { %v941_v55 = vpop.f32.mrf.mxu0 }
 0x172   : > { %v503_v28 = vmul.f32 1.442695, %v500_v27 }
 0x173   : > { %v676_v56 = vpop.f32.mrf.mxu0 }
 0x174   : > { %1037 = vpow2.f32 %v503_v28 }
 0x175   : > { %v942_v57 = vpop.f32.mrf.mxu0 }
 0x17d   : > { %v1036_v29 = vpop.eup %1035 }
 0x17e   : > { %v505_v30 = vadd.f32 1.0, %v1036_v29  ;;  %v508_v33 = vmul.f32 -0.5, %v1036_v29  ;;  %v511_v36 = vand.u32 2147483647, %v1036_v29 }
 0x180   : > { %1039 = vlog2.f32 %v505_v30  ;;  %v509_v34 = vadd.f32 1.0, %v508_v33  ;;  %vm512_vm4 = vcmp.lt.f32.partialorder %v511_v36, 0.0004427343 }
 0x181   : > { %v1038_v31 = vpop.eup %1037 }
 0x182   : > { %v514_v32 = vadd.f32 1.0, %v1038_v31  ;;  %v517_v35 = vmul.f32 -0.5, %v1038_v31  ;;  %v510_v39 = vmul.f32 %v1036_v29, %v509_v34  ;;  %v520_v41 = vand.u32 2147483647, %v1038_v31 }
 0x184   : > { %1041 = vlog2.f32 %v514_v32  ;;  %v518_v40 = vadd.f32 1.0, %v517_v35  ;;  %vm521_vm5 = vcmp.lt.f32.partialorder %v520_v41, 0.0004427343 }
 0x186   : > { %v519_v46 = vmul.f32 %v1038_v31, %v518_v40 }
 0x18d   : > { %v1040_v37 = vpop.eup %1039 }
 0x18e   : > { %v507_v38 = vmul.f32 0.6931472, %v1040_v37 }
 0x190   : > { %v513_v42 = vsel %vm512_vm4, %v510_v39, %v507_v38 }
 0x191   : > { %v1042_v43 = vpop.eup %1041  ;;  %v523_v47 = vadd.f32 %v513_v42, %v495_v44 }
 0x192   : > { %v516_v45 = vmul.f32 0.6931472, %v1042_v43 }
 0x193   : > { %v870_v51 = vadd.f32 -0.6931472, %v523_v47 }
 0x194   : > { %v522_v49 = vsel %vm521_vm5, %v519_v46, %v516_v45 }
 0x195   : > { %v524_v50 = vadd.f32 %v522_v49, %v496_v48 }
 0x197   : > { %v871_v52 = vadd.f32 -0.6931472, %v524_v50 }
 0x199   : > { %v527_v53 = vpack.c.bf16 %v871_v52, %v870_v51 }
 0x19b   : > { %932 = vmatmul.mubr.msk.bf16.vlgmr.msra.gmra.mxu1 %vm567_vm6, %v527_v53 }
 0x25b   : > { %v605_v59 = vpop.f32.mrf.mxu1 }
 0x25c   : > { %v606_v60 = vadd.f32 %v872_v58, %v605_v59 }
 0x25d   : > { %v933_v61 = vpop.f32.mrf.mxu1 }
 0x25e   : > { %v680_v62 = vmul.f32 %v673_v54, %v606_v60 }
 0x25f   : > { %v608_v63 = vpop.f32.mrf.mxu1 }
 0x260   : > { %v895_v0 = vpack.c.bf16 %v680_v62, %v680_v62  ;;  %v609_v1 = vadd.f32 %v872_v58, %v608_v63 }
 0x261   : > { %v934_v2 = vpop.f32.mrf.mxu1 }
 0x262   : > { %691 = vst.msk [vmem:[%s391_s18] sm:$0xf] %vm690_vm7, %v895_v0  ;;  %v681_v3 = vmul.f32 %v676_v56, %v609_v1  ;;  %700 = sbr.rel (!%p1629_p11) target bundleno = 642 (0x282), region = 72 }
 0x264   : > { %v896_v4 = vpack.c.bf16 %v681_v3, %v681_v3 }
 0x266   : > { %692 = vst.msk [vmem:[%s391_s18 + $0x4] sm:$0xf] %vm690_vm7, %v896_v4 }
 0x267   : > { %s1641_s16 = smov (!%p703_p3, %s702_s16), 2 }
 0x268   : > { %s1544_s4 = sshll.u32 %s1641_s16, 6 }
 0x269   : > { %s707_s20 = ssub.s32 128, %s1544_s4 }
 0x26a   : > { %708 = vsyncadd %s694_s11, %s707_s20  ;;  %p887_p0 = scmp.ne.s32.totalorder %s1544_s4, 0  ;;  %s897_s19 = sshll.u32 %s1328_s28, 7 }
 0x26b   : > { %s1554_s15 = scalar_lea.hbm %s1608_s7, %s897_s19  ;;  %s713_s29 = sshll.u32 %s391_s18, 4  ;;  %s1556_s29 = int_to_ptr.vmem [resolvable:$true] %s713_s29 }
 0x26c   : > { %s1173_s9 = scalar_lea.vmem %s1556_s29, %s1544_s4  ;;  %s1264_s21 = smov [#allocation11]  }
 0x26d   : > { %p1174_p9 = scmp.ne.s32.totalorder %s1556_s29, %s1173_s9  ;;  %s1177_s12 = sshll.u32 %s1264_s21, 4  ;;  %s1178_s12 = int_to_ptr.vmem [resolvable:$false] %s1177_s12 }
 0x26e   : > { %s1179_s28 = scalar_lea.vmem %s1178_s12, 256  ;;  %p1180_p7 = scmp.lt.s32.totalorder %s1556_s29, %s1178_s12 }
 0x26f   : > { %p1175_p8 = pnand %p1174_p9, %p887_p0  ;;  %p1181_p2 = scmp.lt.s32.totalorder %s1179_s28, %s1173_s9 }
 0x271   : > { %p1176_p12 = pneg %p1175_p8  ;;  %p1182_p4 = por %p1181_p2, %p1180_p7 }
 0x273   : > { %p1183_p10 = pnand %p1182_p4, %p1176_p12 }
 0x275   : > { %1186 = shalt.err (!%p1183_p10)
}
 0x276   : > { %s1187_s2 = scalar_lea.hbm %s1554_s15, %s1544_s4  ;;  %s1191_s18 = scalar_lea.hbm %s1608_s7, 192 }
 0x277   : > { %p1188_p13 = scmp.ne.s32.totalorder %s1554_s15, %s1187_s2  ;;  %p1192_p6 = scmp.lt.s32.totalorder %s1554_s15, %s1608_s7 }
 0x278   : > { %p1193_p11 = scmp.lt.s32.totalorder %s1191_s18, %s1187_s2 }
 0x279   : > { %p1189_p5 = pnand %p1188_p13, %p887_p0 }
 0x27a   : > { %p1194_p3 = por %p1193_p11, %p1192_p6 }
 0x27b   : > { %p1190_p1 = pneg %p1189_p5 }
 0x27d   : > { %p1195_p9 = pnand %p1194_p3, %p1190_p1 }
 0x27f   : > { %1198 = shalt.err (!%p1195_p9)
}
 0x280   : > { %s1265_s20 = smov 64   ;;  %s1266_s19 = smov 4  }
 0x281   : > { %719 = dma.vmem_to_hbm [thread:$0]  (%p887_p0), %s1556_s29, %s1544_s4, %s1554_s15, %s694_s11, %s1265_s20, %s1265_s20, %s1266_s19  }
 0x282 PF: > { %s728_s13 = sand.u32 1, %s1237_s24   ;;  %p1630_p8 = scmp.ne.s32.totalorder %s1618_s14, 0 }
 0x283   : > { %p1631_p12 = scmp.ge.s32.totalorder %s1249_s27, 2  ;;  %s729_s22 = scalar_lea.sflag [#allocation4], %s728_s13 }
 0x285   : > { %p969_p7 = pnand %p1631_p12, %p1630_p8 }
 0x287   : > { %p970_p2 = pneg %p969_p7 }
 0x289   : > { %1232 = dma.done.wait (%p970_p2), %s729_s22, 128  }
 0x28a   : > { %1234 = vsyncadd (%p970_p2), %s729_s22, 4294967168  ;;  %p24_p4 = scmp.ge.s32.totalorder %s1332_s30, 4   ;;  %s1632_s24 = smov %s1241_s25 }
 0x28b   : > { %s1633_s25 = smov %s1245_s26  ;;  %s1634_s26 = smov %s1344_s10 }
 0x28c   : > { %s1635_s27 = smov %s1332_s30  ;;  %26 = sbr.rel (!%p24_p4) target bundleno = 12 (0xc), region = 118 }
 0x291   :  { %734 = vsyncpa [#allocation3], 1 }
 0x292   :  { %736 = vsyncpa [#allocation3 + $0x1], 1 }
 0x293   :  { %737 = vsyncpa [#allocation6], 1 }
 0x294   :  { %739 = vsyncpa [#allocation6 + $0x1], 1 }
 0x295   :  { %740 = vsyncpa [#allocation9], 1 }
 0x296   :  { %741 = vsyncpa [#allocation4], 1 }
 0x297   :  { %743 = vsyncpa [#allocation4 + $0x1], 1 }

</bundles_post_ra>
